<compile_context>
chip_gen: v5e
topology: v5e:2x2
jax: 0.10.0
libtpu: 0.0.40
codegen_flags: <defaults>
</compile_context>

<pallas_src>
import functools

import jax
import jax.numpy as jnp
from jax.experimental import pallas as pl
from jax.experimental.pallas import tpu as pltpu

BLOCK_CONFIG = {
    "mixvarge_k3k3_f2": {"conv2_kernel_size": 3, "padding": 1, "factor": 2},
    "mixvarge_f1": {"conv2_kernel_size": 1, "padding": 0, "factor": 1},
    "mixvarge_f2": {"conv2_kernel_size": 1, "padding": 0, "factor": 2},
    "mixvarge_f4": {"conv2_kernel_size": 1, "padding": 0, "factor": 4},
    "mixvarge_f2_r": {"conv2_kernel_size": 1, "padding": 0, "factor": 2, "merge_branch": True},
}


# --------------------------------------------------------------------------------------
# chip-aware sizing
# --------------------------------------------------------------------------------------
def _vmem_capacity_bytes():
    try:
        info = pltpu.get_tpu_info()
        for attr in ("vmem_capacity_bytes", "vmem_bytes"):
            v = getattr(info, attr, None)
            if v:
                return int(v)
    except Exception:
        pass
    return 64 * 1024 * 1024                       # conservative: v7x per-TensorCore VMEM


_VMEM_PHYS = _vmem_capacity_bytes()
_VMEM_BUDGET = min(_VMEM_PHYS // 2, 56 * 1024 * 1024)           # per-call tile working set
_VMEM_LIMIT = min((_VMEM_PHYS * 3) // 4, 96 * 1024 * 1024)      # scoped-vmem override
_TM_TARGET = 1024 if _VMEM_PHYS >= 100 * 1024 * 1024 else 512   # bigger tiles on 128MiB chips


# --------------------------------------------------------------------------------------
# small helpers
# --------------------------------------------------------------------------------------
def _round_up(x, m):
    return ((x + m - 1) // m) * m


def _divisors(n):
    ds = set()
    i = 1
    while i * i <= n:
        if n % i == 0:
            ds.add(i)
            ds.add(n // i)
        i += 1
    return sorted(ds)


def _choose_tm(Mp, base, per_row_bytes, fixed_bytes):
    """Row tile: multiple of `base` dividing Mp, as large as the VMEM budget allows
    (<= _TM_TARGET), preferring >= 2 grid steps so both v7x TensorCores get work."""
    cands = [d * base for d in _divisors(Mp // base)]
    fits = [t for t in cands
            if t <= _TM_TARGET and fixed_bytes + per_row_bytes * t <= _VMEM_BUDGET]
    if not fits:
        fits = [base]
    multi = [t for t in fits if Mp // t >= 2]
    return max(multi) if multi else max(fits)


def _pad_rows(a, Mp):
    M = a.shape[0]
    return a if Mp == M else jnp.pad(a, ((0, Mp - M), (0, 0)))


def _pack_rows(a, g):
    """(M, C) -> (M//g, g*C): contiguous reshape (free on the XLA side)."""
    if g == 1:
        return a
    M, C = a.shape
    return a.reshape(M // g, g * C)


def _unpack_rows(a, g, cout):
    if g == 1:
        return a
    return a.reshape(a.shape[0] * g, cout)


def _fold_bn(p, eps=1e-5):
    """Fold eval-mode BatchNorm into conv weights (bf16) and bias (f32, shape (1, Cout))."""
    scale = p["gamma"] / jnp.sqrt(p["var"] + eps)
    w_f = (p["w"] * scale[None, None, None, :]).astype(jnp.bfloat16)
    b_f = (p["beta"] - p["mean"] * scale)[None, :].astype(jnp.float32)
    return w_f, b_f


def _im2col(x, k, stride, padding):
    """NHWC im2col (layout glue in plain JAX).
    TODO(synk): move the 3x3 im2col into the kernel (halo'd row-slab DMA + 9 shifted
    matmuls) to avoid the 9x HBM amplification of the input stream."""
    N, H, W, C = x.shape
    xp = jnp.pad(x, ((0, 0), (padding, padding), (padding, padding), (0, 0)))
    Hout = (H + 2 * padding - k) // stride + 1
    Wout = (W + 2 * padding - k) // stride + 1
    cols = []
    for ky in range(k):
        for kx in range(k):
            patch = jax.lax.slice(
                xp,
                (0, ky, kx, 0),
                (N, ky + (Hout - 1) * stride + 1, kx + (Wout - 1) * stride + 1, C),
                (1, stride, stride, 1),
            )
            cols.append(patch.reshape(N * Hout * Wout, C))
    return jnp.concatenate(cols, axis=-1), (N, Hout, Wout)


# --------------------------------------------------------------------------------------
# lane-dense packing support probe (one-time): (rows, C) -> (rows//g, g*C) in-kernel
# --------------------------------------------------------------------------------------
_LANE_PACK_OK = None


def _lane_pack_supported():
    global _LANE_PACK_OK
    if _LANE_PACK_OK is not None:
        return _LANE_PACK_OK
    rows, c, g = 128, 8, 16

    def _probe_kernel(x_ref, o_ref):
        o_ref[...] = x_ref[...].reshape(rows // g, g * c).astype(o_ref.dtype)

    try:
        x = jnp.arange(rows * c, dtype=jnp.float32).reshape(rows, c)
        out = pl.pallas_call(
            _probe_kernel,
            out_shape=jax.ShapeDtypeStruct((rows // g, g * c), jnp.bfloat16),
            grid_spec=pltpu.PrefetchScalarGridSpec(
                num_scalar_prefetch=0,
                grid=(1,),
                in_specs=[pl.BlockSpec((rows, c), lambda i: (0, 0))],
                out_specs=pl.BlockSpec((rows // g, g * c), lambda i: (0, 0)),
            ),
        )(x)
        out = jax.block_until_ready(out)
        ref = x.reshape(rows // g, g * c).astype(jnp.bfloat16)
        _LANE_PACK_OK = bool(jnp.array_equal(out, ref))
    except Exception:
        _LANE_PACK_OK = False
    return _LANE_PACK_OK


def _lane_group(cout):
    """g output rows packed into one lane-dense 128-wide store row (g=1 -> no packing)."""
    if cout < 128 and 128 % cout == 0 and _lane_pack_supported():
        return 128 // cout
    return 1


# --------------------------------------------------------------------------------------
# Pallas kernel 1: single conv = matmul + folded-BN bias [+ residual add] [+ ReLU]
# --------------------------------------------------------------------------------------
def _conv_kernel(*refs, apply_relu, has_add, g, cout):
    if has_add:
        x_ref, w_ref, b_ref, add_ref, o_ref = refs
    else:
        x_ref, w_ref, b_ref, o_ref = refs
    acc = jnp.dot(x_ref[...], w_ref[...], preferred_element_type=jnp.float32)
    acc = acc + b_ref[...]
    if g > 1:
        acc = acc.reshape(acc.shape[0] // g, g * cout)      # lane-dense repack before store
    if has_add:
        acc = acc + add_ref[...].astype(jnp.float32)        # residual (bf16 stream, packed)
    if apply_relu:
        acc = jnp.maximum(acc, 0.0)
    o_ref[...] = acc.astype(o_ref.dtype)                    # bf16 writeback


def _fused_matmul(x_col, w_col, b, add=None, relu=False):
    M, K = x_col.shape
    Cout = w_col.shape[1]
    has_add = add is not None

    g = _lane_group(Cout)
    base = 8 * g
    Mp = _round_up(M, base)          # ragged pad only (< base rows, usually zero)

    # per output row: x tile (bf16, double-buffered), f32 acc, bf16 out tile (dbl-buffered),
    # optional bf16 add tile (dbl-buffered).
    per_row = 2 * K * 2 + Cout * 4 + 2 * Cout * 2 + (2 * Cout * 2 if has_add else 0)
    fixed = 2 * (K * Cout * 2 + Cout * 4)
    tm = _choose_tm(Mp, base, int(per_row * 1.25), int(fixed * 1.25))

    operands = [_pad_rows(x_col, Mp), w_col, b]
    in_specs = [
        pl.BlockSpec((tm, K), lambda i: (i, 0)),        # bf16 im2col patches
        pl.BlockSpec((K, Cout), lambda i: (0, 0)),      # bf16 folded weights (resident)
        pl.BlockSpec((1, Cout), lambda i: (0, 0)),      # f32 folded bias
    ]
    if has_add:
        operands.append(_pack_rows(_pad_rows(add.astype(jnp.bfloat16), Mp), g))
        in_specs.append(pl.BlockSpec((tm // g, g * Cout), lambda i: (i, 0)))

    kernel = functools.partial(_conv_kernel, apply_relu=relu, has_add=has_add, g=g, cout=Cout)
    out = pl.pallas_call(
        kernel,
        out_shape=jax.ShapeDtypeStruct((Mp // g, g * Cout), jnp.bfloat16),
        grid_spec=pltpu.PrefetchScalarGridSpec(
            num_scalar_prefetch=0,
            grid=(Mp // tm,),
            in_specs=in_specs,
            out_specs=pl.BlockSpec((tm // g, g * Cout), lambda i: (i, 0)),
        ),
        compiler_params=pltpu.CompilerParams(
            dimension_semantics=("parallel",),
            vmem_limit_bytes=_VMEM_LIMIT,
        ),
    )(*operands)
    out = _unpack_rows(out, g, Cout)
    return out[:M] if Mp != M else out


def conv_bn(x, params, stride, padding, relu=False, add=None):
    """ConvModule2d: Conv2d + BN(eval) + optional ReLU (+ optional fused residual add)."""
    w_f, b_f = _fold_bn(params)
    k, _, cin, cout = params["w"].shape
    x_col, (N, Ho, Wo) = _im2col(x.astype(jnp.bfloat16), k, stride, padding)
    w_col = w_f.reshape(k * k * cin, cout)
    add_flat = None if add is None else add.reshape(N * Ho * Wo, cout)
    out = _fused_matmul(x_col, w_col, b_f, add=add_flat, relu=relu)
    return out.reshape(N, Ho, Wo, cout)


# --------------------------------------------------------------------------------------
# Pallas kernel 2: fully fused BasicMixVarGEBlock (conv2 must be 1x1)
#   h   = relu(x_col1 @ W1 + b1)          -> mid activation stays in VMEM/vregs
#   out = relu(h @ W2 + b2 + identity)    identity = centre tap of x_col1 (optionally
#                                          matmul'd with the 1x1 downsample weights)
# --------------------------------------------------------------------------------------
def _block_kernel(*refs, has_downsample, cin, center_off, g, cout):
    if has_downsample:
        x1_ref, w1_ref, b1_ref, w2_ref, b2_ref, wd_ref, bd_ref, o_ref = refs
    else:
        x1_ref, w1_ref, b1_ref, w2_ref, b2_ref, o_ref = refs

    h = jnp.dot(x1_ref[...], w1_ref[...], preferred_element_type=jnp.float32) + b1_ref[...]
    h = jnp.maximum(h, 0.0)                                      # conv1 + BN + ReLU
    out = jnp.dot(h.astype(jnp.bfloat16), w2_ref[...],
                  preferred_element_type=jnp.float32) + b2_ref[...]   # conv2(1x1) + BN

    # identity branch sourced from the im2col centre tap (no extra HBM stream)
    xc = x1_ref[:, center_off:center_off + cin]
    if has_downsample:
        ident = jnp.dot(xc, wd_ref[...], preferred_element_type=jnp.float32) + bd_ref[...]
    else:
        ident = xc.astype(jnp.float32)

    out = jnp.maximum(out + ident, 0.0)                          # short_add + ReLU
    if g > 1:
        out = out.reshape(out.shape[0] // g, g * cout)           # lane-dense repack
    o_ref[...] = out.astype(o_ref.dtype)                         # bf16 writeback


def _fused_block_forward(x, params, meta):
    N, H, W, Cin = x.shape
    k1, s = meta["conv1_k"], meta["stride"]

    w1, b1 = _fold_bn(params["conv1"])
    w2, b2 = _fold_bn(params["conv2"])
    Cmid, Cout = w1.shape[-1], w2.shape[-1]

    x_col1, (N, Ho, Wo) = _im2col(x.astype(jnp.bfloat16), k1, s, (k1 - 1) // 2)
    M = N * Ho * Wo
    K1 = k1 * k1 * Cin
    w1c = w1.reshape(K1, Cmid)
    w2c = w2.reshape(Cmid, Cout)
    # centre tap (ky=kx=k1//2) of a pad=(k1-1)//2 conv samples exactly x[oy*s, ox*s]
    center_off = ((k1 // 2) * k1 + (k1 // 2)) * Cin

    has_ds = params["downsample"] is not None
    if not has_ds:
        assert s == 1 and Cin == Cout, "plain residual requires stride==1 and Cin==Cout"

    g = _lane_group(Cout)
    base = 8 * g
    Mp = _round_up(M, base)

    # per row: x_col (bf16, dbl-buffered), h (f32 + bf16 copy), conv2 acc + identity (f32),
    # bf16 output tile (dbl-buffered).
    per_row = 2 * K1 * 2 + Cmid * 6 + Cout * 8 + 2 * Cout * 2
    fixed = 2 * (K1 * Cmid * 2 + Cmid * 4 + Cmid * Cout * 2 + Cout * 4)
    if has_ds:
        wd, bd = _fold_bn(params["downsample"])
        wdc = wd.reshape(Cin, Cout)
        fixed += 2 * (Cin * Cout * 2 + Cout * 4)

    tm = _choose_tm(Mp, base, int(per_row * 1.25), int(fixed * 1.25))

    operands = [_pad_rows(x_col1, Mp), w1c, b1, w2c, b2]
    in_specs = [
        pl.BlockSpec((tm, K1), lambda i: (i, 0)),
        pl.BlockSpec((K1, Cmid), lambda i: (0, 0)),
        pl.BlockSpec((1, Cmid), lambda i: (0, 0)),
        pl.BlockSpec((Cmid, Cout), lambda i: (0, 0)),
        pl.BlockSpec((1, Cout), lambda i: (0, 0)),
    ]
    if has_ds:
        operands += [wdc, bd]
        in_specs += [
            pl.BlockSpec((Cin, Cout), lambda i: (0, 0)),
            pl.BlockSpec((1, Cout), lambda i: (0, 0)),
        ]

    kernel = functools.partial(_block_kernel, has_downsample=has_ds, cin=Cin,
                               center_off=center_off, g=g, cout=Cout)
    out = pl.pallas_call(
        kernel,
        out_shape=jax.ShapeDtypeStruct((Mp // g, g * Cout), jnp.bfloat16),
        grid_spec=pltpu.PrefetchScalarGridSpec(
            num_scalar_prefetch=0,
            grid=(Mp // tm,),
            in_specs=in_specs,
            out_specs=pl.BlockSpec((tm // g, g * Cout), lambda i: (i, 0)),
        ),
        compiler_params=pltpu.CompilerParams(
            dimension_semantics=("parallel",),
            vmem_limit_bytes=_VMEM_LIMIT,
        ),
    )(*operands)
    out = _unpack_rows(out, g, Cout)
    if Mp != M:
        out = out[:M]
    return out.reshape(N, Ho, Wo, Cout)


def _unfused_block_forward(x, params, meta):
    """Fallback (and reference) path: one fused-matmul kernel per conv (k=3 conv2)."""
    x_b = x.astype(jnp.bfloat16)
    identity = x_b
    if params["downsample"] is not None:
        identity = conv_bn(x_b, params["downsample"], stride=meta["stride"], padding=0, relu=False)
    h = conv_bn(x_b, params["conv1"], stride=meta["stride"],
                padding=(meta["conv1_k"] - 1) // 2, relu=True)
    # conv2 + BN + short_add(identity) + ReLU fused in one kernel call
    return conv_bn(h, params["conv2"], stride=1, padding=meta["conv2_pad"],
                   relu=True, add=identity)


def basic_block_forward(x, params, meta):
    # TODO(synk): fusion_channels path not exercised (empty fusion_channels in this config).
    # TODO(synk): chain consecutive 1x1 stack blocks into one pallas_call (needs in-kernel
    #             im2col of the intermediate activation).
    if meta["conv2_k"] == 1 and meta["conv2_pad"] == 0:
        return _fused_block_forward(x, params, meta)      # whole block = one pallas_call
    return _unfused_block_forward(x, params, meta)        # k3 conv2 variants


# --------------------------------------------------------------------------------------
# Deterministic parameter construction (conv bias = 0, BN eval stats folded)
# --------------------------------------------------------------------------------------
def _init_conv_bn(key, k, cin, cout):
    kw, kg, kb, km, kv = jax.random.split(key, 5)
    return {
        "w": 0.1 * jax.random.normal(kw, (k, k, cin, cout), jnp.float32),
        "gamma": 1.0 + 0.1 * jax.random.normal(kg, (cout,), jnp.float32),
        "beta": 0.1 * jax.random.normal(kb, (cout,), jnp.float32),
        "mean": 0.1 * jax.random.normal(km, (cout,), jnp.float32),
        "var": 1.0 + 0.1 * jnp.abs(jax.random.normal(kv, (cout,), jnp.float32)),
    }


def init_basic_block(key, in_ch, out_ch, stride, cfg):
    conv1_k = cfg.get("conv1_kernel_size", 3)
    conv2_k = cfg.get("conv2_kernel_size", 1)
    factor = cfg.get("factor", 1)
    merge_branch = cfg.get("merge_branch", False)
    mid = out_ch if factor == 1 else int(in_ch * factor)
    k1, k2, k3 = jax.random.split(key, 3)
    params = {
        "conv1": _init_conv_bn(k1, conv1_k, in_ch, mid),
        "conv2": _init_conv_bn(k2, conv2_k, mid, out_ch),
        "downsample": None,
    }
    if merge_branch or not (stride == 1 and in_ch == out_ch):
        params["downsample"] = _init_conv_bn(k3, 1, in_ch, out_ch)
    meta = {
        "conv1_k": conv1_k,
        "conv2_k": conv2_k,
        "conv2_pad": cfg.get("padding", 0),
        "stride": stride,
    }
    return params, meta


def init_mixvarge_block(key, in_ch, block_ch, head_op, stack_ops, stride,
                        stack_factor=1, downsample_num=0):
    keys = jax.random.split(key, 1 + len(stack_ops) + downsample_num)
    head = init_basic_block(keys[0], in_ch, block_ch, stride, BLOCK_CONFIG[head_op])
    stacks = []
    stack_num = len(stack_ops)
    for i, op in enumerate(stack_ops):
        if stack_num > 1:
            if i == 0:
                ic, oc = block_ch, stack_factor * block_ch
            elif i == stack_num - 1:
                ic, oc = stack_factor * block_ch, block_ch
            else:
                ic = oc = stack_factor * block_ch
        else:
            ic = oc = block_ch
        stacks.append(init_basic_block(keys[1 + i], ic, oc, 1, BLOCK_CONFIG[op]))
    ds = [_init_conv_bn(keys[1 + stack_num + j], 3, block_ch, block_ch)
          for j in range(downsample_num)]
    return {"head": head, "stack": stacks, "ds": ds}


def mixvarge_block_forward(x, params, output_downsample=True):
    hp, hm = params["head"]
    x = basic_block_forward(x, hp, hm)
    for sp, sm in params["stack"]:
        x = basic_block_forward(x, sp, sm)
    if not output_downsample:
        return x.astype(jnp.float32)
    ds_ret = []
    ds = x
    for dsp in params["ds"]:
        ds = conv_bn(ds, dsp, stride=2, padding=1, relu=False)   # conv + BN, no act
        ds_ret.append(ds)
    # external contract stays f32 (single cheap cast per returned tensor)
    return x.astype(jnp.float32), [d.astype(jnp.float32) for d in ds_ret]


# --------------------------------------------------------------------------------------
if __name__ == "__main__":
    key = jax.random.PRNGKey(0)
    kx, kp = jax.random.split(key)

    # Small shapes consistent with the module: NCHW input like PyTorch, then -> NHWC.
    N, Cin, H, W = 2, 4, 16, 16
    block_ch = 8
    x_nchw = jax.random.normal(kx, (N, Cin, H, W), jnp.float32)
    x = jnp.transpose(x_nchw, (0, 2, 3, 1))  # NCHW -> NHWC

    params = init_mixvarge_block(
        kp,
        in_ch=Cin,
        block_ch=block_ch,
        head_op="mixvarge_f2",                              # fused single-kernel block path
        stack_ops=["mixvarge_f2", "mixvarge_k3k3_f2"],      # fused path + k3k3 fallback path
        stride=2,
        stack_factor=1,
        downsample_num=2,                                   # two 3x3 s2 conv+BN downsample outputs
    )

    # Sanity: the fully fused block kernel must match the per-conv reference path.
    hp, hm = params["head"]
    fused_head = _fused_block_forward(x, hp, hm).astype(jnp.float32)
    ref_head = _unfused_block_forward(x, hp, hm).astype(jnp.float32)
    assert jnp.allclose(fused_head, ref_head, rtol=2e-2, atol=2e-2), "fused block mismatch"

    out, ds_list = mixvarge_block_forward(x, params, output_downsample=True)
    out = jax.block_until_ready(out)
    for d in ds_list:
        jax.block_until_ready(d)

    assert out.shape == (N, H // 2, W // 2, block_ch)
    assert ds_list[0].shape == (N, H // 4, W // 4, block_ch)
    assert ds_list[1].shape == (N, H // 8, W // 8, block_ch)
    assert bool(jnp.all(jnp.isfinite(out)))
    print("KERNEL_OK")
</pallas_src>

<mosaic_0001>
module attributes {stable_mosaic.version = 11 : i64} {
  func.func @_probe_kernel(%arg0: i32, %arg1: memref<128x8xf32, #tpu.memory_space<vmem>>, %arg2: memref<8x128xbf16, #tpu.memory_space<vmem>>) attributes {dimension_semantics = [#tpu.dimension_semantics<arbitrary>], iteration_bounds = array<i64: 1>, scalar_prefetch = 0 : i64, scratch_operands = 0 : i64, tpu.core_type = #tpu.core_type<tc>, window_params = [{pipeline_mode = #tpu.pipeline_mode<synchronous>, transform_indices = @transform_0, window_bounds = array<i64: 128, 8>}, {pipeline_mode = #tpu.pipeline_mode<synchronous>, transform_indices = @transform_1, window_bounds = array<i64: 8, 128>}]} {
    %c0 = arith.constant 0 : index
    %c0_0 = arith.constant 0 : index
    %0 = vector.load %arg1[%c0, %c0_0] : memref<128x8xf32, #tpu.memory_space<vmem>>, vector<128x8xf32>
    %1 = vector.shape_cast %0 : vector<128x8xf32> to vector<8x128xf32>
    %2 = arith.truncf %1 : vector<8x128xf32> to vector<8x128xbf16>
    %c0_1 = arith.constant 0 : index
    %c0_2 = arith.constant 0 : index
    %3 = vector.load %arg2[%c0_1, %c0_2] : memref<8x128xbf16, #tpu.memory_space<vmem>>, vector<8x128xbf16>
    tpu.vector_store %arg2[%c0_1, %c0_2], %2 {strides = array<i32>} : memref<8x128xbf16, #tpu.memory_space<vmem>>, vector<8x128xbf16>,
    return
  }
  func.func @transform_0(%arg0: i32) -> (i32, i32) {
    %c0_i32 = arith.constant 0 : i32
    %c0_i32_0 = arith.constant 0 : i32
    %c0_i32_1 = arith.constant 0 : i32
    return %c0_i32, %c0_i32_0 : i32, i32
  }
  func.func @transform_1(%arg0: i32) -> (i32, i32) {
    %c0_i32 = arith.constant 0 : i32
    %c0_i32_0 = arith.constant 0 : i32
    %c0_i32_1 = arith.constant 0 : i32
    return %c0_i32, %c0_i32_0 : i32, i32
  }
}

module attributes {stable_mosaic.version = 11 : i64} {
  func.func @_block_kernel(%arg0: i32, %arg1: memref<64x36xbf16, #tpu.memory_space<vmem>>, %arg2: memref<36x8xbf16, #tpu.memory_space<vmem>>, %arg3: memref<1x8xf32, #tpu.memory_space<vmem>>, %arg4: memref<8x8xbf16, #tpu.memory_space<vmem>>, %arg5: memref<1x8xf32, #tpu.memory_space<vmem>>, %arg6: memref<4x8xbf16, #tpu.memory_space<vmem>>, %arg7: memref<1x8xf32, #tpu.memory_space<vmem>>, %arg8: memref<64x8xbf16, #tpu.memory_space<vmem>>) attributes {dimension_semantics = [#tpu.dimension_semantics<parallel>], iteration_bounds = array<i64: 2>, scalar_prefetch = 0 : i64, scratch_operands = 0 : i64, tpu.core_type = #tpu.core_type<tc>, window_params = [{transform_indices = @transform_0, window_bounds = array<i64: 64, 36>}, {pipeline_mode = #tpu.pipeline_mode<synchronous>, transform_indices = @transform_1, window_bounds = array<i64: 36, 8>}, {pipeline_mode = #tpu.pipeline_mode<synchronous>, transform_indices = @transform_2, window_bounds = array<i64: 1, 8>}, {pipeline_mode = #tpu.pipeline_mode<synchronous>, transform_indices = @transform_3, window_bounds = array<i64: 8, 8>}, {pipeline_mode = #tpu.pipeline_mode<synchronous>, transform_indices = @transform_4, window_bounds = array<i64: 1, 8>}, {pipeline_mode = #tpu.pipeline_mode<synchronous>, transform_indices = @transform_5, window_bounds = array<i64: 4, 8>}, {pipeline_mode = #tpu.pipeline_mode<synchronous>, transform_indices = @transform_6, window_bounds = array<i64: 1, 8>}, {transform_indices = @transform_7, window_bounds = array<i64: 64, 8>}]} {
    %c0 = arith.constant 0 : index
    %c0_0 = arith.constant 0 : index
    %0 = vector.load %arg1[%c0, %c0_0] : memref<64x36xbf16, #tpu.memory_space<vmem>>, vector<64x36xbf16>
    %c0_1 = arith.constant 0 : index
    %c0_2 = arith.constant 0 : index
    %1 = vector.load %arg2[%c0_1, %c0_2] : memref<36x8xbf16, #tpu.memory_space<vmem>>, vector<36x8xbf16>
    %cst = arith.constant dense<0.000000e+00> : vector<64x8xf32>
    %2 = tpu.matmul %0, %1, %cst {dimension_numbers = #tpu.dot_dimension_numbers<[1], [0], [0], [1], [0, 0, 1, 1], [], []>} : vector<64x36xbf16>, vector<36x8xbf16>, vector<64x8xf32> -> vector<64x8xf32>
    %c0_3 = arith.constant 0 : index
    %c0_4 = arith.constant 0 : index
    %3 = vector.load %arg3[%c0_3, %c0_4] : memref<1x8xf32, #tpu.memory_space<vmem>>, vector<1x8xf32>
    %4 = vector.broadcast %3 : vector<1x8xf32> to vector<64x8xf32>
    %5 = arith.addf %2, %4 : vector<64x8xf32>
    %cst_5 = arith.constant 0.000000e+00 : f32
    %6 = vector.broadcast %cst_5 : f32 to vector<64x8xf32>
    %7 = arith.maximumf %5, %6 : vector<64x8xf32>
    %8 = arith.truncf %7 : vector<64x8xf32> to vector<64x8xbf16>
    %c0_6 = arith.constant 0 : index
    %c0_7 = arith.constant 0 : index
    %9 = vector.load %arg4[%c0_6, %c0_7] : memref<8x8xbf16, #tpu.memory_space<vmem>>, vector<8x8xbf16>
    %cst_8 = arith.constant dense<0.000000e+00> : vector<64x8xf32>
    %10 = tpu.matmul %8, %9, %cst_8 {dimension_numbers = #tpu.dot_dimension_numbers<[1], [0], [0], [1], [0, 0, 1, 1], [], []>} : vector<64x8xbf16>, vector<8x8xbf16>, vector<64x8xf32> -> vector<64x8xf32>
    %c0_9 = arith.constant 0 : index
    %c0_10 = arith.constant 0 : index
    %11 = vector.load %arg5[%c0_9, %c0_10] : memref<1x8xf32, #tpu.memory_space<vmem>>, vector<1x8xf32>
    %12 = vector.broadcast %11 : vector<1x8xf32> to vector<64x8xf32>
    %13 = arith.addf %10, %12 : vector<64x8xf32>
    %c0_11 = arith.constant 0 : index
    %c16 = arith.constant 16 : index
    %14 = vector.load %arg1[%c0_11, %c16] : memref<64x36xbf16, #tpu.memory_space<vmem>>, vector<64x4xbf16>
    %c0_12 = arith.constant 0 : index
    %c0_13 = arith.constant 0 : index
    %15 = vector.load %arg6[%c0_12, %c0_13] : memref<4x8xbf16, #tpu.memory_space<vmem>>, vector<4x8xbf16>
    %cst_14 = arith.constant dense<0.000000e+00> : vector<64x8xf32>
    %16 = tpu.matmul %14, %15, %cst_14 {dimension_numbers = #tpu.dot_dimension_numbers<[1], [0], [0], [1], [0, 0, 1, 1], [], []>} : vector<64x4xbf16>, vector<4x8xbf16>, vector<64x8xf32> -> vector<64x8xf32>
    %c0_15 = arith.constant 0 : index
    %c0_16 = arith.constant 0 : index
    %17 = vector.load %arg7[%c0_15, %c0_16] : memref<1x8xf32, #tpu.memory_space<vmem>>, vector<1x8xf32>
    %18 = vector.broadcast %17 : vector<1x8xf32> to vector<64x8xf32>
    %19 = arith.addf %16, %18 : vector<64x8xf32>
    %20 = arith.addf %13, %19 : vector<64x8xf32>
    %cst_17 = arith.constant 0.000000e+00 : f32
    %21 = vector.broadcast %cst_17 : f32 to vector<64x8xf32>
    %22 = arith.maximumf %20, %21 : vector<64x8xf32>
    %23 = arith.truncf %22 : vector<64x8xf32> to vector<64x8xbf16>
    %c0_18 = arith.constant 0 : index
    %c0_19 = arith.constant 0 : index
    %24 = vector.load %arg8[%c0_18, %c0_19] : memref<64x8xbf16, #tpu.memory_space<vmem>>, vector<64x8xbf16>
    tpu.vector_store %arg8[%c0_18, %c0_19], %23 {strides = array<i32>} : memref<64x8xbf16, #tpu.memory_space<vmem>>, vector<64x8xbf16>,
    return
  }
  func.func @transform_0(%arg0: i32) -> (i32, i32) {
    %c0_i32 = arith.constant 0 : i32
    %c0_i32_0 = arith.constant 0 : i32
    return %arg0, %c0_i32 : i32, i32
  }
  func.func @transform_1(%arg0: i32) -> (i32, i32) {
    %c0_i32 = arith.constant 0 : i32
    %c0_i32_0 = arith.constant 0 : i32
    %c0_i32_1 = arith.constant 0 : i32
    return %c0_i32, %c0_i32_0 : i32, i32
  }
  func.func @transform_2(%arg0: i32) -> (i32, i32) {
    %c0_i32 = arith.constant 0 : i32
    %c0_i32_0 = arith.constant 0 : i32
    %c0_i32_1 = arith.constant 0 : i32
    return %c0_i32, %c0_i32_0 : i32, i32
  }
  func.func @transform_3(%arg0: i32) -> (i32, i32) {
    %c0_i32 = arith.constant 0 : i32
    %c0_i32_0 = arith.constant 0 : i32
    %c0_i32_1 = arith.constant 0 : i32
    return %c0_i32, %c0_i32_0 : i32, i32
  }
  func.func @transform_4(%arg0: i32) -> (i32, i32) {
    %c0_i32 = arith.constant 0 : i32
    %c0_i32_0 = arith.constant 0 : i32
    %c0_i32_1 = arith.constant 0 : i32
    return %c0_i32, %c0_i32_0 : i32, i32
  }
  func.func @transform_5(%arg0: i32) -> (i32, i32) {
    %c0_i32 = arith.constant 0 : i32
    %c0_i32_0 = arith.constant 0 : i32
    %c0_i32_1 = arith.constant 0 : i32
    return %c0_i32, %c0_i32_0 : i32, i32
  }
  func.func @transform_6(%arg0: i32) -> (i32, i32) {
    %c0_i32 = arith.constant 0 : i32
    %c0_i32_0 = arith.constant 0 : i32
    %c0_i32_1 = arith.constant 0 : i32
    return %c0_i32, %c0_i32_0 : i32, i32
  }
  func.func @transform_7(%arg0: i32) -> (i32, i32) {
    %c0_i32 = arith.constant 0 : i32
    %c0_i32_0 = arith.constant 0 : i32
    return %arg0, %c0_i32 : i32, i32
  }
}

</mosaic_0001>

<bundles_post_ra>
// kernel: tpu_custom_call.1
= control target key start
LH: loop header
LB: loop body
LE: loop exit
PB: predicated region body
PF: predicated region fallthrough
CT: control target
= control target key end

     0   :  { %s708_s24 = smov 0   ;;  %s784_s0 = inlined_call_operand.vmem [shape: bf16[128,36], index: 0, kind: input, shape index: {}]   ;;  %s785_s1 = inlined_call_operand.vmem [shape: bf16[36,8], index: 1, kind: input, shape index: {}]   ;;  %s786_s2 = inlined_call_operand.vmem [shape: f32[1,8], index: 2, kind: input, shape index: {}]   ;;  %s787_s3 = inlined_call_operand.vmem [shape: bf16[8,8], index: 3, kind: input, shape index: {}]   ;;  %s788_s4 = inlined_call_operand.vmem [shape: f32[1,8], index: 4, kind: input, shape index: {}]   ;;  %s789_s5 = inlined_call_operand.vmem [shape: bf16[4,8], index: 5, kind: input, shape index: {}]   ;;  %s790_s6 = inlined_call_operand.vmem [shape: f32[1,8], index: 6, kind: input, shape index: {}]   ;;  %s791_s7 = inlined_call_operand.vmem [shape: bf16[128,8], index: 7, kind: output, shape index: {}]  }
   0x1 LB: > { %s591_s25 = sadd.s32 4294967295, %s665_s24   ;;  %p595_p0 = scmp.ge.s32.totalorder %s665_s24, 1  ;;  %s665_s24 = sphi %s708_s24, %s17_s24  }
   0x2   : > { %p238_p1 = scmp.lt.s32.totalorder %s665_s24, 3 }
   0x4   : > { %p239_p2 = pnand %p595_p0, %p238_p1 }
   0x5   : > { %s596_s28 = sshll.u32 (!%p239_p2), %s591_s25, 3  ;;  %s667_s12 = smov (!%p239_p2), 112  }
   0x6   : > { %242 = sbr.rel (%p239_p2) target bundleno = 359 (0x167), region = 48  ;;  %p271_p3 = scmp.lt.s32.totalorder (!%p239_p2), %s596_s28, 15 }
   0xb   : > { %v295_v0 = vld [vmem:[%s785_s1 + $0x10] sm:$0x3]  ;;  %vm348_vm0 = vcmask 1041408   ;;  %s793_s28 = smov (!%p271_p3, %s596_s28), 15  ;;  %v643_v4 = vld [vmem:[%s785_s1 + $0x8] sm:$0xff]  ;;  %v642_v7 = vld [vmem:[%s785_s1] sm:$0xff] }
   0xc   : > { %v329_v1 = vunpack.c.l.b16 %v295_v0  ;;  %s597_s29 = sshll.u32 %s793_s28, 2  ;;  %vm335_vm1 = vcmask 293888   ;;  %v444_v10 = vld [vmem:[%s789_s5] sm:$0x3]  ;;  %vm411_vm2 = vcmask 1043456   ;;  %vm457_vm3 = vcmask 31744  }
   0xd   : > { %s274_s11 = scalar_lea.vmem %s784_s0, %s597_s29  ;;  %v471_v11 = vsel %vm348_vm0, %v444_v10, 0  ;;  %v393_v12 = vld [vmem:[%s787_s3] sm:$0xf]  ;;  %vm398_vm4 = vcmask 64512   ;;  %s763_s30 = scalar_lea.vmem %s791_s7, %s597_s29  ;;  %vm526_vm5 = vcmask 60416  }
   0xe   : > { %v332_v2 = vpack.c.b16 %v329_v1, %v329_v1  ;;  %v638_v5 = vld [vmem:[%s274_s11] sm:$0xff]  ;;  %v640_v6 = vld [vmem:[%s274_s11 + $0x10] sm:$0xff]  ;;  %v639_v8 = vld [vmem:[%s274_s11 + $0x8] sm:$0xff]  ;;  %480 = vmatpush.bf16.msra.mxu2 %v471_v11  ;;  %v413_v13 = vsel %vm411_vm2, %v393_v12, 0 }
   0xf   : > { %449 = vrot.lane.b32.xlu0 %v638_v5, %s667_s12  ;;  %453 = vrot.lane.b32.xlu1 %v640_v6, %s667_s12  ;;  %v641_v9 = vld [vmem:[%s274_s11 + $0x18] sm:$0xff]  ;;  %v656_v17 = vld [vmem:[%s786_s2] ss:$0 sm:$0xff] }
  0x10   : > { %v350_v3 = vsel %vm348_vm0, %v332_v2, 0  ;;  %422 = vmatpush.bf16.msra.mxu1 %v413_v13  ;;  %v657_v49 = vld [vmem:[%s790_s6] ss:$0 sm:$0xff] }
  0x11   : > { %357 = vmatpush.bf16.msra.mxu0 %v350_v3  ;;  %644 = vmatpush.bf16.msra.mxu3 %v350_v3  ;;  %v658_v50 = vld [vmem:[%s788_s4] ss:$0 sm:$0xff] }
  0x15   : > { %358 = vmatpush.bf16.msra.mxu0 %v643_v4  ;;  %645 = vmatpush.bf16.msra.mxu3 %v643_v4 }
  0x17   : > { %451 = vrot.lane.b32.xlu0 %v639_v8, %s667_s12  ;;  %455 = vrot.lane.b32.xlu1 %v641_v9, %s667_s12 }
  0x19   : > { %359 = vmatpush.bf16.msra.mxu0 %v642_v7  ;;  %646 = vmatpush.bf16.msra.mxu3 %v642_v7 }
  0x1c   : > { %624 = vmatmul.msk.bf16.vlgmr.msra.gmra.mxu0 %vm335_vm1, %v638_v5  ;;  %625 = vmatmul.msk.bf16.vlgmr.msra.gmra.mxu3 %vm335_vm1, %v639_v8 }
  0x2c   : > { %626 = vmatmul.msk.bf16.gmra.mxu3 %vm335_vm1, %v640_v6 }
  0x3c   : > { %627 = vmatmul.msk.bf16.gmra.mxu3 %vm335_vm1, %v641_v9 }
  0x81   : > { %v450_v14 = vpop.permute.xlu0 %449  ;;  %v454_v24 = vpop.permute.xlu1 %453 }
  0x82   : > { %632 = vmatmul.msk.bf16.vlgmr.msra.gmra.mxu2 %vm457_vm3, %v450_v14 }
  0x89   : > { %v452_v15 = vpop.permute.xlu0 %451  ;;  %v456_v32 = vpop.permute.xlu1 %455 }
  0x92   : > { %633 = vmatmul.msk.bf16.gmra.mxu2 %vm457_vm3, %v452_v15 }
  0x99   : > { %v361_v16 = vpop.f32.mrf.mxu0 }
  0x9a   : > { %v362_v19 = vadd.f32 %v656_v17, %v361_v16 }
  0x9c   : > { %v381_v22 = vmax.f32 %v362_v19, 0.0 }
  0x9f   : > { %v366_v18 = vpop.f32.mrf.mxu3 }
  0xa0   : > { %v367_v27 = vadd.f32 %v656_v17, %v366_v18 }
  0xa1   : > { %v363_v20 = vpop.f32.mrf.mxu0 }
  0xa2   : > { %v364_v21 = vadd.f32 %v656_v17, %v363_v20  ;;  %634 = vmatmul.msk.bf16.gmra.mxu2 %vm457_vm3, %v454_v24  ;;  %v383_v30 = vmax.f32 %v367_v27, 0.0 }
  0xa4   : > { %v382_v23 = vmax.f32 %v364_v21, 0.0 }
  0xa6   : > { %v389_v25 = vpack.c.bf16 %v382_v23, %v381_v22 }
  0xa7   : > { %v368_v26 = vpop.f32.mrf.mxu3 }
  0xa8   : > { %628 = vmatmul.msk.bf16.vlgmr.msra.gmra.mxu1 %vm398_vm4, %v389_v25  ;;  %v369_v28 = vadd.f32 %v656_v17, %v368_v26 }
  0xaa   : > { %v384_v31 = vmax.f32 %v369_v28, 0.0 }
  0xac   : > { %v390_v33 = vpack.c.bf16 %v384_v31, %v383_v30 }
  0xaf   : > { %v371_v29 = vpop.f32.mrf.mxu3 }
  0xb0   : > { %v372_v35 = vadd.f32 %v656_v17, %v371_v29 }
  0xb2   : > { %635 = vmatmul.msk.bf16.gmra.mxu2 %vm457_vm3, %v456_v32  ;;  %v385_v38 = vmax.f32 %v372_v35, 0.0 }
  0xb7   : > { %v373_v34 = vpop.f32.mrf.mxu3 }
  0xb8   : > { %629 = vmatmul.msk.bf16.gmra.mxu1 %vm398_vm4, %v390_v33  ;;  %v374_v36 = vadd.f32 %v656_v17, %v373_v34 }
  0xba   : > { %v386_v39 = vmax.f32 %v374_v36, 0.0 }
  0xbc   : > { %v391_v40 = vpack.c.bf16 %v386_v39, %v385_v38 }
  0xbf   : > { %v376_v37 = vpop.f32.mrf.mxu3 }
  0xc0   : > { %v377_v42 = vadd.f32 %v656_v17, %v376_v37 }
  0xc2   : > { %v387_v44 = vmax.f32 %v377_v42, 0.0 }
  0xc7   : > { %v378_v41 = vpop.f32.mrf.mxu3 }
  0xc8   : > { %630 = vmatmul.msk.bf16.gmra.mxu1 %vm398_vm4, %v391_v40  ;;  %v379_v43 = vadd.f32 %v656_v17, %v378_v41 }
  0xca   : > { %v388_v45 = vmax.f32 %v379_v43, 0.0 }
  0xcc   : > { %v392_v46 = vpack.c.bf16 %v388_v45, %v387_v44 }
  0xd8   : > { %631 = vmatmul.msk.bf16.gmra.mxu1 %vm398_vm4, %v392_v46 }
 0x105   : > { %v482_v47 = vpop.f32.mrf.mxu2 }
 0x106   : > { %v483_v51 = vadd.f32 %v657_v49, %v482_v47 }
 0x10d   : > { %v484_v48 = vpop.f32.mrf.mxu2 }
 0x10e   : > { %v485_v59 = vadd.f32 %v657_v49, %v484_v48 }
 0x115   : > { %v487_v55 = vpop.f32.mrf.mxu2 }
 0x116   : > { %v488_v1 = vadd.f32 %v657_v49, %v487_v55 }
 0x11d   : > { %v489_v63 = vpop.f32.mrf.mxu2 }
 0x11e   : > { %v490_v9 = vadd.f32 %v657_v49, %v489_v63 }
 0x125   : > { %v424_v52 = vpop.f32.mrf.mxu1  ;;  %v492_v8 = vpop.f32.mrf.mxu2 }
 0x126   : > { %v425_v53 = vadd.f32 %v658_v50, %v424_v52  ;;  %v493_v14 = vadd.f32 %v657_v49, %v492_v8 }
 0x128   : > { %v502_v54 = vadd.f32 %v483_v51, %v425_v53 }
 0x12a   : > { %v510_v56 = vmax.f32 %v502_v54, 0.0 }
 0x12c   : > { %v518_v57 = vpack.c.bf16 %v510_v56, %v510_v56 }
 0x12d   : > { %v426_v58 = vpop.f32.mrf.mxu1  ;;  %v494_v17 = vpop.f32.mrf.mxu2 }
 0x12e   : > { %527 = vst.msk [vmem:[%s763_s30] sm:$0xf] %vm526_vm5, %v518_v57  ;;  %v427_v60 = vadd.f32 %v658_v50, %v426_v58  ;;  %v495_v22 = vadd.f32 %v657_v49, %v494_v17 }
 0x130   : > { %v503_v61 = vadd.f32 %v485_v59, %v427_v60 }
 0x132   : > { %v511_v62 = vmax.f32 %v503_v61, 0.0 }
 0x134   : > { %v519_v0 = vpack.c.bf16 %v511_v62, %v511_v62 }
 0x135   : > { %v429_v2 = vpop.f32.mrf.mxu1  ;;  %v497_v25 = vpop.f32.mrf.mxu2 }
 0x136   : > { %528 = vst.msk [vmem:[%s763_s30 + $0x4] sm:$0xf] %vm526_vm5, %v519_v0  ;;  %v430_v3 = vadd.f32 %v658_v50, %v429_v2  ;;  %v498_v28 = vadd.f32 %v657_v49, %v497_v25 }
 0x138   : > { %v504_v4 = vadd.f32 %v488_v1, %v430_v3 }
 0x13a   : > { %v512_v5 = vmax.f32 %v504_v4, 0.0 }
 0x13c   : > { %v520_v6 = vpack.c.bf16 %v512_v5, %v512_v5 }
 0x13d   : > { %v431_v7 = vpop.f32.mrf.mxu1  ;;  %v499_v33 = vpop.f32.mrf.mxu2 }
 0x13e   : > { %529 = vst.msk [vmem:[%s763_s30 + $0x8] sm:$0xf] %vm526_vm5, %v520_v6  ;;  %v432_v10 = vadd.f32 %v658_v50, %v431_v7  ;;  %v500_v36 = vadd.f32 %v657_v49, %v499_v33 }
 0x140   : > { %v505_v11 = vadd.f32 %v490_v9, %v432_v10 }
 0x142   : > { %v513_v12 = vmax.f32 %v505_v11, 0.0 }
 0x144   : > { %v521_v13 = vpack.c.bf16 %v513_v12, %v513_v12 }
 0x145   : > { %v434_v15 = vpop.f32.mrf.mxu1 }
 0x146   : > { %530 = vst.msk [vmem:[%s763_s30 + $0xc] sm:$0xf] %vm526_vm5, %v521_v13  ;;  %v435_v16 = vadd.f32 %v658_v50, %v434_v15 }
 0x148   : > { %v506_v18 = vadd.f32 %v493_v14, %v435_v16 }
 0x14a   : > { %v514_v19 = vmax.f32 %v506_v18, 0.0 }
 0x14c   : > { %v522_v20 = vpack.c.bf16 %v514_v19, %v514_v19 }
 0x14d   : > { %v436_v21 = vpop.f32.mrf.mxu1 }
 0x14e   : > { %531 = vst.msk [vmem:[%s763_s30 + $0x10] sm:$0xf] %vm526_vm5, %v522_v20  ;;  %v437_v23 = vadd.f32 %v658_v50, %v436_v21 }
 0x150   : > { %v507_v24 = vadd.f32 %v495_v22, %v437_v23 }
 0x152   : > { %v515_v26 = vmax.f32 %v507_v24, 0.0 }
 0x154   : > { %v523_v27 = vpack.c.bf16 %v515_v26, %v515_v26 }
 0x155   : > { %v439_v29 = vpop.f32.mrf.mxu1 }
 0x156   : > { %532 = vst.msk [vmem:[%s763_s30 + $0x14] sm:$0xf] %vm526_vm5, %v523_v27  ;;  %v440_v30 = vadd.f32 %v658_v50, %v439_v29 }
 0x158   : > { %v508_v31 = vadd.f32 %v498_v28, %v440_v30 }
 0x15a   : > { %v516_v32 = vmax.f32 %v508_v31, 0.0 }
 0x15c   : > { %v524_v34 = vpack.c.bf16 %v516_v32, %v516_v32 }
 0x15d   : > { %v441_v35 = vpop.f32.mrf.mxu1 }
 0x15e   : > { %533 = vst.msk [vmem:[%s763_s30 + $0x18] sm:$0xf] %vm526_vm5, %v524_v34  ;;  %v442_v37 = vadd.f32 %v658_v50, %v441_v35 }
 0x160   : > { %v509_v38 = vadd.f32 %v500_v36, %v442_v37 }
 0x162   : > { %v517_v39 = vmax.f32 %v509_v38, 0.0 }
 0x164   : > { %v525_v40 = vpack.c.bf16 %v517_v39, %v517_v39 }
 0x166   : > { %534 = vst.msk [vmem:[%s763_s30 + $0x1c] sm:$0xf] %vm526_vm5, %v525_v40 }
 0x167 PF: > { %s17_s24 = sadd.s32 1, %s665_s24  }
 0x168   : > { %p14_p4 = scmp.ge.s32.totalorder %s17_s24, 4  }
 0x16a   :  { %16 = sbr.rel (!%p14_p4) target bundleno = 1 (0x1), region = 78 }

</bundles_post_ra>
